<compile_context>
chip_gen: v5e
topology: v5e:2x2
jax: 0.10.0
libtpu: 0.0.40
codegen_flags: <defaults>
</compile_context>

<pallas_src>
import jax
import jax.numpy as jnp
from jax import lax
from jax.experimental import pallas as pl
from jax.experimental.pallas import tpu as pltpu


def _round_up(a: int, m: int) -> int:
    return ((a + m - 1) // m) * m


def _sdtsf_kernel(x_ref, w_ref, b_ref, o_ref):
    # x_ref : (bm, K)   w_ref : (N, K)   b_ref : (1, N)   o_ref : (bm, N)
    # Contract x dim 1 with w dim 1 -> x @ W^T directly on the MXU (W consumed
    # as stored, no transpose op), f32 accumulation.
    z = lax.dot_general(
        x_ref[...], w_ref[...],
        dimension_numbers=(((1,), (1,)), ((), ())),
        preferred_element_type=jnp.float32,
    )
    z = z + b_ref[...].astype(jnp.float32)
    # 2*sigmoid(z) - 1 == tanh(z/2): single EUP transcendental + one VPU mul.
    o_ref[...] = jnp.tanh(0.5 * z).astype(o_ref.dtype)


def _vmem_limit(needed_bytes: int) -> int:
    # Generous headroom, clamped to a portable range (v5e scoped default 16 MiB).
    return int(min(100 * 1024 * 1024, max(2 * needed_bytes + (2 << 20), 8 << 20)))


def state_dependent_time_step_function(x, weight, bias, *, block_m=2048):
    """x: (B, input_size), weight: (output_size, input_size), bias: (output_size,)."""
    B, in_size = x.shape
    out_size, in_w = weight.shape
    assert in_w == in_size

    # --- Row-packing factor for a lane-dense output slab ------------------------
    # Fold P batch rows into the lane dimension so the stored last dim is a
    # multiple of 128 (unmasked stores / dense writeback DMA).
    if out_size < 128 and 128 % out_size == 0 and B % (128 // out_size) == 0:
        P = 128 // out_size
    else:
        P = 1

    rows = B // P
    K_eff = P * in_size
    N_eff = P * out_size

    x_p = x.reshape(rows, K_eff)          # contiguous row-major reshape: free
    if P == 1:
        w_p = weight
        b_p = bias.reshape(1, out_size)
    else:
        # Block-diagonal weight: x_p @ w_p^T evaluates P independent rows of the
        # original Linear per packed row.  Grid-invariant, stays VMEM-resident.
        w_p = jnp.kron(jnp.eye(P, dtype=weight.dtype), weight)   # (N_eff, K_eff)
        b_p = jnp.tile(bias, P).reshape(1, N_eff)

    itemsize = x.dtype.itemsize
    out_p_shape = jax.ShapeDtypeStruct((rows, N_eff), x.dtype)

    # Advisory cost for XLA's scheduler around this tiny custom call.
    cost = pl.CostEstimate(
        flops=2 * rows * K_eff * N_eff,
        transcendentals=rows * N_eff,
        bytes_accessed=(x_p.size + w_p.size + b_p.size + rows * N_eff) * itemsize,
    )

    if rows <= 8:
        # Tiny problem: single VMEM tile, no pipelining machinery.
        needed = 2 * (x_p.size + rows * N_eff + w_p.size + b_p.size) * itemsize
        out_p = pl.pallas_call(
            _sdtsf_kernel,
            out_shape=out_p_shape,
            compiler_params=pltpu.CompilerParams(
                vmem_limit_bytes=_vmem_limit(needed)),
            cost_estimate=cost,
        )(x_p, w_p, b_p)
        return out_p.reshape(B, out_size)

    # --- Grid path: tile packed batch rows --------------------------------------
    # Prefer fat tiles (block_m original rows), but always form >= 2 row blocks so
    # v7x's second TensorCore gets work ("parallel" axis is sharded across TCs).
    block_rows = max(8, (block_m // P // 8) * 8)
    bm = max(8, min(block_rows, _round_up(pl.cdiv(rows, 2), 8)))
    grid = (pl.cdiv(rows, bm),)

    needed = (2 * (bm * K_eff + bm * N_eff)          # double-buffered x / out tiles
              + 2 * (w_p.size + b_p.size)) * itemsize  # W / b (default double-buffered)
    out_p = pl.pallas_call(
        _sdtsf_kernel,
        out_shape=out_p_shape,
        grid=grid,
        in_specs=[
            pl.BlockSpec((bm, K_eff), lambda i: (i, 0)),
            # Grid-invariant blocks: W and b are not re-DMA'd per step.
            pl.BlockSpec((N_eff, K_eff), lambda i: (0, 0)),
            pl.BlockSpec((1, N_eff), lambda i: (0, 0)),
        ],
        out_specs=pl.BlockSpec((bm, N_eff), lambda i: (i, 0)),
        compiler_params=pltpu.CompilerParams(
            dimension_semantics=("parallel",),   # v7x: rows split across 2 TCs
            vmem_limit_bytes=_vmem_limit(needed),
        ),
        cost_estimate=cost,
    )(x_p, w_p, b_p)
    return out_p.reshape(B, out_size)


def _ref(x, weight, bias):
    return 2.0 * jax.nn.sigmoid(x @ weight.T + bias) - 1.0


if __name__ == "__main__":
    # Small shapes consistent with the module: batch=8, input_size=32, output_size=16
    batch, input_size, output_size = 8, 32, 16

    key = jax.random.PRNGKey(0)
    kx, kw, kb, kx2 = jax.random.split(key, 4)

    x = jax.random.normal(kx, (batch, input_size), dtype=jnp.float32)
    # Deterministic parameter init (synthetic; mimics nn.Linear shapes).
    bound = 1.0 / (input_size ** 0.5)
    weight = jax.random.uniform(kw, (output_size, input_size),
                                minval=-bound, maxval=bound, dtype=jnp.float32)
    bias = jax.random.uniform(kb, (output_size,),
                              minval=-bound, maxval=bound, dtype=jnp.float32)

    # Small-batch (gridless, single lane-dense VMEM tile) path.
    out = state_dependent_time_step_function(x, weight, bias)
    out = jax.block_until_ready(out)
    assert out.shape == (batch, output_size)
    assert jnp.allclose(out, _ref(x, weight, bias), atol=1e-5, rtol=1e-5)

    # Batch-tiled (grid, lane-dense output, >=2 parallel row blocks) path.
    big_batch = 512
    x_big = jax.random.normal(kx2, (big_batch, input_size), dtype=jnp.float32)
    out_big = state_dependent_time_step_function(x_big, weight, bias)
    out_big = jax.block_until_ready(out_big)
    assert out_big.shape == (big_batch, output_size)
    assert jnp.allclose(out_big, _ref(x_big, weight, bias), atol=1e-5, rtol=1e-5)

    print("KERNEL_OK")
</pallas_src>

<mosaic_0001>
module attributes {stable_mosaic.version = 11 : i64} {
  func.func @_sdtsf_kernel(%arg0: memref<1x256xf32, #tpu.memory_space<vmem>>, %arg1: memref<128x256xf32, #tpu.memory_space<vmem>>, %arg2: memref<1x128xf32, #tpu.memory_space<vmem>>, %arg3: memref<1x128xf32, #tpu.memory_space<vmem>>) attributes {dimension_semantics = [], scalar_prefetch = 0 : i64, scratch_operands = 0 : i64, tpu.core_type = #tpu.core_type<tc>} {
    %c0 = arith.constant 0 : index
    %c0_0 = arith.constant 0 : index
    %0 = vector.load %arg0[%c0, %c0_0] : memref<1x256xf32, #tpu.memory_space<vmem>>, vector<1x256xf32>
    %c0_1 = arith.constant 0 : index
    %c0_2 = arith.constant 0 : index
    %1 = vector.load %arg1[%c0_1, %c0_2] : memref<128x256xf32, #tpu.memory_space<vmem>>, vector<128x256xf32>
    %cst = arith.constant dense<0.000000e+00> : vector<1x128xf32>
    %2 = tpu.matmul %0, %1, %cst {dimension_numbers = #tpu.dot_dimension_numbers<[1], [1], [0], [0], [0, 0, 1, 0], [], []>} : vector<1x256xf32>, vector<128x256xf32>, vector<1x128xf32> -> vector<1x128xf32>
    %c0_3 = arith.constant 0 : index
    %c0_4 = arith.constant 0 : index
    %3 = vector.load %arg2[%c0_3, %c0_4] : memref<1x128xf32, #tpu.memory_space<vmem>>, vector<1x128xf32>
    %4 = arith.addf %2, %3 : vector<1x128xf32>
    %cst_5 = arith.constant 5.000000e-01 : f32
    %5 = vector.broadcast %cst_5 : f32 to vector<1x128xf32>
    %6 = arith.mulf %5, %4 : vector<1x128xf32>
    %7 = math.tanh %6 : vector<1x128xf32>
    %c0_6 = arith.constant 0 : index
    %c0_7 = arith.constant 0 : index
    %8 = vector.load %arg3[%c0_6, %c0_7] : memref<1x128xf32, #tpu.memory_space<vmem>>, vector<1x128xf32>
    tpu.vector_store %arg3[%c0_6, %c0_7], %7 {strides = array<i32>} : memref<1x128xf32, #tpu.memory_space<vmem>>, vector<1x128xf32>,
    return
  }
}

</mosaic_0001>

<bundles_post_ra>
// kernel: tpu_custom_call.1
= control target key start
LH: loop header
LB: loop body
LE: loop exit
PB: predicated region body
PF: predicated region fallthrough
CT: control target
= control target key end

     0   :  { %8 = vsyncpa [#allocation3], 0  ;;  %s267_s0 = inlined_call_operand.hbm [shape: f32[1,256], index: 0, kind: input, shape index: {}]   ;;  %s268_s1 = inlined_call_operand.hbm [shape: f32[128,256], index: 1, kind: input, shape index: {}]   ;;  %s269_s2 = inlined_call_operand.vmem [shape: f32[1,128], index: 2, kind: input, shape index: {}]   ;;  %s270_s3 = inlined_call_operand.hbm [shape: f32[1,128], index: 3, kind: output, shape index: {}]  }
   0x1   :  { %9 = vsyncpa [#allocation6], 0 }
   0x2   :  { %10 = vsyncpa [#allocation4], 0  ;;  %s16_s14 = sshll.u32 %s267_s0, 4  ;;  %s230_s15 = smov [#allocation2]   ;;  %s17_s14 = int_to_ptr.hbm [resolvable:$true] %s16_s14 }
   0x3   :  { %s18_s16 = sshll.u32 %s230_s15, 4  ;;  %s26_s19 = sshll.u32 %s268_s1, 4  ;;  %s19_s16 = int_to_ptr.vmem [resolvable:$true] %s18_s16  ;;  %s27_s19 = int_to_ptr.hbm [resolvable:$true] %s26_s19 }
   0x4   :  { %21 = dma.hbm_to_vmem [thread:$0]  %s17_s14, 32, %s19_s16, [#allocation3]  }
   0x5   :  { %s231_s20 = smov [#allocation5]   ;;  %s232_s22 = smov 256  }
   0x6   :  { %s28_s21 = sshll.u32 %s231_s20, 4  ;;  %s233_s23 = smov 16   ;;  %s29_s21 = int_to_ptr.vmem [resolvable:$true] %s28_s21 }
   0x7   :  { %34 = dma.hbm_to_vmem [thread:$0]  %s27_s19, 4096, %s29_s21, [#allocation6], %s232_s22, %s232_s22, %s233_s23  }
   0x8   :  { %224 = dma.done.wait [#allocation3], 32  }
   0x9   :  { %225 = vsyncadd [#allocation3], 4294967264 }
   0xa   :  { %226 = dma.done.wait [#allocation6], 4096  }
   0xb   :  { %227 = vsyncadd [#allocation6], 4294963200  ;;  %v76_v0 = vld [vmem:[#allocation5 + $0xf0] sm:$0xff]  ;;  %v77_v1 = vld [vmem:[#allocation5 + $0xf8] sm:$0xff]  ;;  %s234_s24 = smov [#allocation7]   ;;  %s134_s28 = sshll.u32 %s270_s3, 4  ;;  %s135_s28 = int_to_ptr.hbm [resolvable:$true] %s134_s28 }
   0xc   :  { %84 = vmatpush.xpose.msra.mxu0 %v76_v0  ;;  %104 = vmatpush.xpose.msra.mxu1 %v77_v1  ;;  %v74_v2 = vld [vmem:[#allocation5 + $0xe0] sm:$0xff]  ;;  %v75_v3 = vld [vmem:[#allocation5 + $0xe8] sm:$0xff]  ;;  %v72_v4 = vld [vmem:[#allocation5 + $0xd0] sm:$0xff]  ;;  %s132_s25 = sshll.u32 %s234_s24, 4  ;;  %s133_s25 = int_to_ptr.vmem [resolvable:$true] %s132_s25 }
   0xd   :  { %v73_v5 = vld [vmem:[#allocation5 + $0xd8] sm:$0xff]  ;;  %v70_v6 = vld [vmem:[#allocation5 + $0xc0] sm:$0xff]  ;;  %v71_v7 = vld [vmem:[#allocation5 + $0xc8] sm:$0xff] }
   0xe   :  { %v68_v8 = vld [vmem:[#allocation5 + $0xb0] sm:$0xff]  ;;  %v69_v9 = vld [vmem:[#allocation5 + $0xb8] sm:$0xff]  ;;  %v66_v10 = vld [vmem:[#allocation5 + $0xa0] sm:$0xff] }
   0xf   :  { %v67_v11 = vld [vmem:[#allocation5 + $0xa8] sm:$0xff]  ;;  %v64_v12 = vld [vmem:[#allocation5 + $0x90] sm:$0xff]  ;;  %v65_v13 = vld [vmem:[#allocation5 + $0x98] sm:$0xff] }
  0x10   :  { %85 = vmatpush.xpose.msra.mxu0 %v74_v2  ;;  %105 = vmatpush.xpose.msra.mxu1 %v75_v3  ;;  %v62_v14 = vld [vmem:[#allocation5 + $0x80] sm:$0xff]  ;;  %v63_v15 = vld [vmem:[#allocation5 + $0x88] sm:$0xff]  ;;  %v60_v16 = vld [vmem:[#allocation5 + $0x70] sm:$0xff] }
  0x11   :  { %v61_v17 = vld [vmem:[#allocation5 + $0x78] sm:$0xff]  ;;  %v58_v18 = vld [vmem:[#allocation5 + $0x60] sm:$0xff]  ;;  %v59_v19 = vld [vmem:[#allocation5 + $0x68] sm:$0xff] }
  0x12   :  { %v56_v20 = vld [vmem:[#allocation5 + $0x50] sm:$0xff]  ;;  %v57_v21 = vld [vmem:[#allocation5 + $0x58] sm:$0xff]  ;;  %v54_v22 = vld [vmem:[#allocation5 + $0x40] sm:$0xff] }
  0x13   :  { %v55_v23 = vld [vmem:[#allocation5 + $0x48] sm:$0xff]  ;;  %v52_v24 = vld [vmem:[#allocation5 + $0x30] sm:$0xff]  ;;  %v53_v25 = vld [vmem:[#allocation5 + $0x38] sm:$0xff] }
  0x14   :  { %86 = vmatpush.xpose.msra.mxu0 %v72_v4  ;;  %106 = vmatpush.xpose.msra.mxu1 %v73_v5  ;;  %v50_v26 = vld [vmem:[#allocation5 + $0x20] sm:$0xff]  ;;  %v51_v27 = vld [vmem:[#allocation5 + $0x28] sm:$0xff]  ;;  %v48_v28 = vld [vmem:[#allocation5 + $0x10] sm:$0xff] }
  0x15   :  { %v49_v29 = vld [vmem:[#allocation5 + $0x18] sm:$0xff]  ;;  %v46_v31 = vld [vmem:[#allocation5] sm:$0xff]  ;;  %v47_v32 = vld [vmem:[#allocation5 + $0x8] sm:$0xff] }
  0x16   :  { %v45_v30 = vld [vmem:[#allocation2] sm:$0x3] }
  0x17   :  { %v80_v33 = vperm.slane %v45_v30, 0  ;;  %v81_v34 = vperm.slane %v45_v30, 1  ;;  %v78_v35 = vld [vmem:[%s269_s2] sm:$0x1] }
  0x18   :  { %87 = vmatpush.xpose.msra.mxu0 %v70_v6  ;;  %107 = vmatpush.xpose.msra.mxu1 %v71_v7 }
  0x1c   :  { %88 = vmatpush.xpose.msra.mxu0 %v68_v8  ;;  %108 = vmatpush.xpose.msra.mxu1 %v69_v9 }
  0x20   :  { %89 = vmatpush.xpose.msra.mxu0 %v66_v10  ;;  %109 = vmatpush.xpose.msra.mxu1 %v67_v11 }
  0x24   :  { %90 = vmatpush.xpose.msra.mxu0 %v64_v12  ;;  %110 = vmatpush.xpose.msra.mxu1 %v65_v13 }
  0x28   :  { %91 = vmatpush.xpose.msra.mxu0 %v62_v14  ;;  %111 = vmatpush.xpose.msra.mxu1 %v63_v15 }
  0x2c   :  { %92 = vmatpush.xpose.msra.mxu0 %v60_v16  ;;  %112 = vmatpush.xpose.msra.mxu1 %v61_v17 }
  0x30   :  { %93 = vmatpush.xpose.msra.mxu0 %v58_v18  ;;  %113 = vmatpush.xpose.msra.mxu1 %v59_v19 }
  0x34   :  { %94 = vmatpush.xpose.msra.mxu0 %v56_v20  ;;  %114 = vmatpush.xpose.msra.mxu1 %v57_v21 }
  0x38   :  { %95 = vmatpush.xpose.msra.mxu0 %v54_v22  ;;  %115 = vmatpush.xpose.msra.mxu1 %v55_v23 }
  0x3c   :  { %96 = vmatpush.xpose.msra.mxu0 %v52_v24  ;;  %116 = vmatpush.xpose.msra.mxu1 %v53_v25 }
  0x40   :  { %97 = vmatpush.xpose.msra.mxu0 %v50_v26  ;;  %117 = vmatpush.xpose.msra.mxu1 %v51_v27 }
  0x44   :  { %98 = vmatpush.xpose.msra.mxu0 %v48_v28  ;;  %118 = vmatpush.xpose.msra.mxu1 %v49_v29 }
  0x48   :  { %99 = vmatpush.xpose.msra.mxu0 %v46_v31  ;;  %119 = vmatpush.xpose.msra.mxu1 %v47_v32 }
  0x4b   :  { %100 = vmatmul.f32.vlgmr.msra.gmra.mxu0 %v80_v33  ;;  %120 = vmatmul.f32.vlgmr.msra.gmra.mxu1 %v81_v34 }
  0xc8   :  { %v101_v36 = vpop.f32.mrf.mxu0  ;;  %v121_v37 = vpop.f32.mrf.mxu1 }
  0xc9   :  { %v102_v38 = vadd.f32 %v101_v36, %v78_v35 }
  0xcb   :  { %v122_v39 = vadd.f32 %v121_v37, %v102_v38 }
  0xcd   :  { %v124_v40 = vmul.f32 0.5, %v122_v39 }
  0xcf   :  { %150 = vtanh.f32 %v124_v40 }
  0xd5   :  { %v151_v41 = vpop.eup %150 }
  0xd6   :  { %126 = vst [vmem:[#allocation7] sm:$0x1] %v151_v41 }
  0xd7   :  { %137 = dma.vmem_to_hbm [thread:$0]  %s133_s25, 16, %s135_s28, [#allocation4]  }
  0xd8   :  { %228 = dma.done.wait [#allocation4], 16  }
  0xd9   :  { %229 = vsyncadd [#allocation4], 4294967280 }
  0xda   :  { %142 = vsyncpa [#allocation3], 1 }
  0xdb   :  { %143 = vsyncpa [#allocation6], 1 }
  0xdc   :  { %144 = vsyncpa [#allocation4], 1 }

</bundles_post_ra>
